<compile_context>
chip_gen: v6e
topology: v6e:2x2x1
jax: 0.10.0
libtpu: 0.0.40
codegen_flags: <defaults>
</compile_context>

<pallas_src>
import jax
import jax.numpy as jnp
from jax.experimental import pallas as pl
from jax.experimental.pallas import tpu as pltpu


def _round_up(x, m):
    return ((x + m - 1) // m) * m


# Feature-detect single-buffering of constant-index ("resident") operands.
try:
    pl.BlockSpec((8, 128), lambda i: (0, 0), pipeline_mode=pl.Buffered(1))
    _SINGLE_BUFFER_OK = True
except Exception:  # older jax: kwarg unavailable -> Pallas double-buffers them.
    _SINGLE_BUFFER_OK = False


def _resident_spec(block_shape, index_map):
    """BlockSpec for an operand whose index_map is constant (DMA'd once)."""
    if _SINGLE_BUFFER_OK:
        return pl.BlockSpec(block_shape, index_map, pipeline_mode=pl.Buffered(1))
    return pl.BlockSpec(block_shape, index_map)


def _vmem_capacity_bytes():
    """Physical VMEM of the current TPU generation (fallback: v7x's 64 MiB)."""
    cap = 64 * 1024 * 1024
    try:
        cap = int(getattr(pltpu.get_tpu_info(), "vmem_capacity_bytes", cap))
    except Exception:
        pass
    return cap


# ----------------------------------------------------------------------------
# Kernels
# ----------------------------------------------------------------------------
def _resident_kernel(x_ref, w1_ref, b1_ref, w2_ref, b2_ref, o_ref):
    # fc1: (TB, F) @ (F, H), f32 accumulation on the MXU.
    h = jnp.dot(x_ref[...], w1_ref[...], preferred_element_type=jnp.float32)
    h = h + b1_ref[...].astype(jnp.float32)
    # op_transformer = [ReLU]  (elementwise, fused between the two Linears).
    h = jnp.maximum(h, 0.0)
    # out: (TB, H) @ (H, F), f32 accumulation; cast h back to the weight dtype
    # so a bf16 weight path keeps the MXU fast path (no-op for f32 weights).
    y = jnp.dot(h.astype(w2_ref.dtype), w2_ref[...],
                preferred_element_type=jnp.float32)
    y = y + b2_ref[...].astype(jnp.float32)
    o_ref[...] = y.astype(o_ref.dtype)


def _htiled_kernel(x_ref, w1_ref, b1_ref, w2_ref, b2_ref, o_ref, acc_ref):
    # Hidden-dim-tiled fallback: grid = (batch_tiles, hidden_tiles),
    # hidden axis is a reduction ("arbitrary"), output accumulated in f32 VMEM.
    hk = pl.program_id(1)

    @pl.when(hk == 0)
    def _init():
        acc_ref[...] = jnp.zeros_like(acc_ref)

    h = jnp.dot(x_ref[...], w1_ref[...], preferred_element_type=jnp.float32)
    h = h + b1_ref[...].astype(jnp.float32)
    h = jnp.maximum(h, 0.0)                       # ReLU per hidden slice is exact
    acc_ref[...] += jnp.dot(h.astype(w2_ref.dtype), w2_ref[...],
                            preferred_element_type=jnp.float32)

    @pl.when(hk == pl.num_programs(1) - 1)
    def _finalize():
        o_ref[...] = (acc_ref[...] + b2_ref[...].astype(jnp.float32)
                      ).astype(o_ref.dtype)


# ----------------------------------------------------------------------------
# Wrapper
# ----------------------------------------------------------------------------
def linear_autoencoder(x, w1, b1, w2, b2, *,
                       block_batch=512,
                       compute_dtype=None,
                       vmem_budget_bytes=None,
                       force_hidden_tiling=False):
    """Fused fc1 -> op_transformer([ReLU]) -> out.

    x:  (B, F)
    w1: (F, H)   b1: (H,) or (1, H)     (already transposed vs. nn.Linear)
    w2: (H, F)   b2: (F,) or (1, F)
    compute_dtype: e.g. jnp.bfloat16 to run the MXU dots in bf16 (f32 accum).
    """
    B, F = x.shape
    H = w1.shape[1]
    out_dtype = x.dtype

    if compute_dtype is not None:
        x = x.astype(compute_dtype)
        w1 = w1.astype(compute_dtype)
        w2 = w2.astype(compute_dtype)
    if x.dtype != w1.dtype:
        x = x.astype(w1.dtype)

    b1 = jnp.reshape(b1, (1, H))
    b2 = jnp.reshape(b2, (1, F))

    cap = _vmem_capacity_bytes()
    if vmem_budget_bytes is None:
        # ~90 MiB on v5e/v6e (128 MiB physical), ~45 MiB on v7x (64 MiB/TC).
        vmem_budget_bytes = cap * 7 // 10
    vmem_limit = int(max(vmem_budget_bytes, cap * 9 // 10))

    xb = jnp.dtype(x.dtype).itemsize
    wb = jnp.dtype(w1.dtype).itemsize
    ob = jnp.dtype(out_dtype).itemsize

    weight_bufs = 1 if _SINGLE_BUFFER_OK else 2   # actual buffer multiplicity
    resident = weight_bufs * wb * (F * H + H * F + H + F)
    # Per batch-row VMEM: x (double-buffered), out (double-buffered),
    # f32 hidden intermediate (TB, H) and f32 second-matmul result (TB, F).
    per_row = 2 * xb * F + 2 * ob * F + 4 * H + 4 * F

    use_resident = (not force_hidden_tiling) and \
        (resident + 8 * per_row <= vmem_budget_bytes)

    if use_resident:
        # ---------------- fast path: weights resident, batch-tiled ----------
        tb_fit = (vmem_budget_bytes - resident) // max(per_row, 1)
        TB = int(min(block_batch, tb_fit))
        TB = max(8, (TB // 8) * 8)                # sublane-aligned
        TB = min(TB, _round_up(B, 8))             # don't over-tile tiny batches
        if B >= 16:
            # v7x megacore: keep >= 2 balanced batch steps so the "parallel"
            # axis can split across both TensorCores (harmless on v5e/v6e).
            TB = min(TB, _round_up(-(-B // 2), 8))
        B_pad = _round_up(B, TB)
        # NOTE: zero-padded batch rows compute relu(b1) @ w2 + b2 (NOT zeros);
        # they are sliced off below, never consumed.
        xp = jnp.pad(x, ((0, B_pad - B), (0, 0))) if B_pad != B else x

        out = pl.pallas_call(
            _resident_kernel,
            out_shape=jax.ShapeDtypeStruct((B_pad, F), out_dtype),
            grid_spec=pltpu.PrefetchScalarGridSpec(
                num_scalar_prefetch=0,
                grid=(B_pad // TB,),
                in_specs=[
                    pl.BlockSpec((TB, F), lambda i: (i, 0)),   # x: streamed
                    _resident_spec((F, H), lambda i: (0, 0)),  # w1: resident
                    _resident_spec((1, H), lambda i: (0, 0)),  # b1
                    _resident_spec((H, F), lambda i: (0, 0)),  # w2
                    _resident_spec((1, F), lambda i: (0, 0)),  # b2
                ],
                out_specs=pl.BlockSpec((TB, F), lambda i: (i, 0)),
            ),
            compiler_params=pltpu.CompilerParams(
                dimension_semantics=("parallel",),
                vmem_limit_bytes=vmem_limit,
            ),
        )(xp, w1, b1, w2, b2)
        return out[:B] if B_pad != B else out

    # ---------------- fallback: tile the hidden dim (reduction axis) --------
    TB = min(block_batch, 256)
    TB = max(8, (TB // 8) * 8)
    TB = min(TB, _round_up(B, 8))
    if B >= 16:
        TB = min(TB, _round_up(-(-B // 2), 8))
    TH = min(512, _round_up(H, 128))

    def _fits(tb, th):
        fixed = tb * F * (2 * xb + 2 * ob) + 4 * tb * F + weight_bufs * wb * F
        per = 2 * wb * (2 * F + 1) * th + 4 * tb * th
        return fixed + per <= vmem_budget_bytes

    while not _fits(TB, TH) and TH > 128:
        TH = max(128, (TH // 2 // 128) * 128)
    while not _fits(TB, TH) and TB > 8:
        TB = max(8, (TB // 2 // 8) * 8)

    H_pad = _round_up(H, TH)
    B_pad = _round_up(B, TB)
    xp = jnp.pad(x, ((0, B_pad - B), (0, 0))) if B_pad != B else x
    # Zero-padded hidden units are inert: padded w1 cols / b1 give
    # h = relu(0) = 0 and padded w2 rows are zero, so they contribute nothing.
    # (In a real deployment this weight padding would be hoisted to init time.)
    w1p = jnp.pad(w1, ((0, 0), (0, H_pad - H))) if H_pad != H else w1
    b1p = jnp.pad(b1, ((0, 0), (0, H_pad - H))) if H_pad != H else b1
    w2p = jnp.pad(w2, ((0, H_pad - H), (0, 0))) if H_pad != H else w2

    out = pl.pallas_call(
        _htiled_kernel,
        out_shape=jax.ShapeDtypeStruct((B_pad, F), out_dtype),
        grid_spec=pltpu.PrefetchScalarGridSpec(
            num_scalar_prefetch=0,
            grid=(B_pad // TB, H_pad // TH),
            in_specs=[
                pl.BlockSpec((TB, F), lambda i, h: (i, 0)),     # x
                pl.BlockSpec((F, TH), lambda i, h: (0, h)),     # w1 column tile
                pl.BlockSpec((1, TH), lambda i, h: (0, h)),     # b1 tile
                pl.BlockSpec((TH, F), lambda i, h: (h, 0)),     # w2 row tile
                _resident_spec((1, F), lambda i, h: (0, 0)),    # b2 resident
            ],
            out_specs=pl.BlockSpec((TB, F), lambda i, h: (i, 0)),
            scratch_shapes=[pltpu.VMEM((TB, F), jnp.float32)],
        ),
        compiler_params=pltpu.CompilerParams(
            dimension_semantics=("parallel", "arbitrary"),
            vmem_limit_bytes=vmem_limit,
        ),
    )(xp, w1p, b1p, w2p, b2)
    return out[:B] if B_pad != B else out


def init_params(key, in_features, hidden_features, dtype=jnp.float32):
    """Deterministic init mimicking nn.Linear's uniform(-1/sqrt(fan_in), +)."""
    k1, k2, k3, k4 = jax.random.split(key, 4)
    bound1 = 1.0 / jnp.sqrt(in_features)
    bound2 = 1.0 / jnp.sqrt(hidden_features)
    # Stored already transposed: (in, out).
    w1 = jax.random.uniform(k1, (in_features, hidden_features), dtype, -bound1, bound1)
    b1 = jax.random.uniform(k2, (1, hidden_features), dtype, -bound1, bound1)
    w2 = jax.random.uniform(k3, (hidden_features, in_features), dtype, -bound2, bound2)
    b2 = jax.random.uniform(k4, (1, in_features), dtype, -bound2, bound2)
    return w1, b1, w2, b2


if __name__ == "__main__":
    key = jax.random.PRNGKey(0)
    kx, kp = jax.random.split(key)

    batch = 16
    in_features = 32
    hidden_features = 16

    x = jax.random.normal(kx, (batch, in_features), dtype=jnp.float32)
    w1, b1, w2, b2 = init_params(kp, in_features, hidden_features)

    # Pure-JAX reference of the fused forward pass.
    ref = jnp.maximum(x @ w1 + b1, 0.0) @ w2 + b2

    # Fast path: resident weights, batch-tiled streaming of x / out.
    out = jax.block_until_ready(linear_autoencoder(x, w1, b1, w2, b2))
    assert out.shape == (batch, in_features)
    assert jnp.allclose(out, ref, atol=1e-5, rtol=1e-5)

    # Fallback path (hidden-dim tiling + f32 accumulator) used when the
    # weights cannot stay resident (e.g. v7x's 64 MiB VMEM); exercised here.
    out2 = jax.block_until_ready(
        linear_autoencoder(x, w1, b1, w2, b2, force_hidden_tiling=True))
    assert jnp.allclose(out2, ref, atol=1e-5, rtol=1e-5)

    print("KERNEL_OK")
</pallas_src>

<mosaic_0001>
module attributes {stable_mosaic.version = 11 : i64} {
  func.func @_resident_kernel(%arg0: i32, %arg1: memref<8x32xf32, #tpu.memory_space<vmem>>, %arg2: memref<32x16xf32, #tpu.memory_space<vmem>>, %arg3: memref<1x16xf32, #tpu.memory_space<vmem>>, %arg4: memref<16x32xf32, #tpu.memory_space<vmem>>, %arg5: memref<1x32xf32, #tpu.memory_space<vmem>>, %arg6: memref<8x32xf32, #tpu.memory_space<vmem>>) attributes {dimension_semantics = [#tpu.dimension_semantics<parallel>], iteration_bounds = array<i64: 2>, scalar_prefetch = 0 : i64, scratch_operands = 0 : i64, tpu.core_type = #tpu.core_type<tc>, window_params = [{transform_indices = @transform_0, window_bounds = array<i64: 8, 32>}, {pipeline_mode = #tpu.pipeline_mode<synchronous>, transform_indices = @transform_1, window_bounds = array<i64: 32, 16>}, {pipeline_mode = #tpu.pipeline_mode<synchronous>, transform_indices = @transform_2, window_bounds = array<i64: 1, 16>}, {pipeline_mode = #tpu.pipeline_mode<synchronous>, transform_indices = @transform_3, window_bounds = array<i64: 16, 32>}, {pipeline_mode = #tpu.pipeline_mode<synchronous>, transform_indices = @transform_4, window_bounds = array<i64: 1, 32>}, {transform_indices = @transform_5, window_bounds = array<i64: 8, 32>}]} {
    %c0 = arith.constant 0 : index
    %c0_0 = arith.constant 0 : index
    %0 = vector.load %arg1[%c0, %c0_0] : memref<8x32xf32, #tpu.memory_space<vmem>>, vector<8x32xf32>
    %c0_1 = arith.constant 0 : index
    %c0_2 = arith.constant 0 : index
    %1 = vector.load %arg2[%c0_1, %c0_2] : memref<32x16xf32, #tpu.memory_space<vmem>>, vector<32x16xf32>
    %cst = arith.constant dense<0.000000e+00> : vector<8x16xf32>
    %2 = tpu.matmul %0, %1, %cst {dimension_numbers = #tpu.dot_dimension_numbers<[1], [0], [0], [1], [0, 0, 1, 1], [], []>} : vector<8x32xf32>, vector<32x16xf32>, vector<8x16xf32> -> vector<8x16xf32>
    %c0_3 = arith.constant 0 : index
    %c0_4 = arith.constant 0 : index
    %3 = vector.load %arg3[%c0_3, %c0_4] : memref<1x16xf32, #tpu.memory_space<vmem>>, vector<1x16xf32>
    %4 = vector.broadcast %3 : vector<1x16xf32> to vector<8x16xf32>
    %5 = arith.addf %2, %4 : vector<8x16xf32>
    %cst_5 = arith.constant 0.000000e+00 : f32
    %6 = vector.broadcast %cst_5 : f32 to vector<8x16xf32>
    %7 = arith.maximumf %5, %6 : vector<8x16xf32>
    %c0_6 = arith.constant 0 : index
    %c0_7 = arith.constant 0 : index
    %8 = vector.load %arg4[%c0_6, %c0_7] : memref<16x32xf32, #tpu.memory_space<vmem>>, vector<16x32xf32>
    %cst_8 = arith.constant dense<0.000000e+00> : vector<8x32xf32>
    %9 = tpu.matmul %7, %8, %cst_8 {dimension_numbers = #tpu.dot_dimension_numbers<[1], [0], [0], [1], [0, 0, 1, 1], [], []>} : vector<8x16xf32>, vector<16x32xf32>, vector<8x32xf32> -> vector<8x32xf32>
    %c0_9 = arith.constant 0 : index
    %c0_10 = arith.constant 0 : index
    %10 = vector.load %arg5[%c0_9, %c0_10] : memref<1x32xf32, #tpu.memory_space<vmem>>, vector<1x32xf32>
    %11 = vector.broadcast %10 : vector<1x32xf32> to vector<8x32xf32>
    %12 = arith.addf %9, %11 : vector<8x32xf32>
    %c0_11 = arith.constant 0 : index
    %c0_12 = arith.constant 0 : index
    %13 = vector.load %arg6[%c0_11, %c0_12] : memref<8x32xf32, #tpu.memory_space<vmem>>, vector<8x32xf32>
    tpu.vector_store %arg6[%c0_11, %c0_12], %12 {strides = array<i32>} : memref<8x32xf32, #tpu.memory_space<vmem>>, vector<8x32xf32>,
    return
  }
  func.func @transform_0(%arg0: i32) -> (i32, i32) {
    %c0_i32 = arith.constant 0 : i32
    %c0_i32_0 = arith.constant 0 : i32
    return %arg0, %c0_i32 : i32, i32
  }
  func.func @transform_1(%arg0: i32) -> (i32, i32) {
    %c0_i32 = arith.constant 0 : i32
    %c0_i32_0 = arith.constant 0 : i32
    %c0_i32_1 = arith.constant 0 : i32
    return %c0_i32, %c0_i32_0 : i32, i32
  }
  func.func @transform_2(%arg0: i32) -> (i32, i32) {
    %c0_i32 = arith.constant 0 : i32
    %c0_i32_0 = arith.constant 0 : i32
    %c0_i32_1 = arith.constant 0 : i32
    return %c0_i32, %c0_i32_0 : i32, i32
  }
  func.func @transform_3(%arg0: i32) -> (i32, i32) {
    %c0_i32 = arith.constant 0 : i32
    %c0_i32_0 = arith.constant 0 : i32
    %c0_i32_1 = arith.constant 0 : i32
    return %c0_i32, %c0_i32_0 : i32, i32
  }
  func.func @transform_4(%arg0: i32) -> (i32, i32) {
    %c0_i32 = arith.constant 0 : i32
    %c0_i32_0 = arith.constant 0 : i32
    %c0_i32_1 = arith.constant 0 : i32
    return %c0_i32, %c0_i32_0 : i32, i32
  }
  func.func @transform_5(%arg0: i32) -> (i32, i32) {
    %c0_i32 = arith.constant 0 : i32
    %c0_i32_0 = arith.constant 0 : i32
    return %arg0, %c0_i32 : i32, i32
  }
}

</mosaic_0001>

<bundles_post_ra>
// kernel: tpu_custom_call.1
= control target key start
LH: loop header
LB: loop body
LE: loop exit
PB: predicated region body
PF: predicated region fallthrough
CT: control target
= control target key end

     0   :  { %10 = vsyncpa [#allocation3], 0  ;;  %s759_s0 = inlined_call_operand.vmem [shape: f32[16,32], index: 0, kind: input, shape index: {}]   ;;  %s760_s1 = inlined_call_operand.vmem [shape: f32[32,16], index: 1, kind: input, shape index: {}]   ;;  %s761_s2 = inlined_call_operand.vmem [shape: f32[1,16], index: 2, kind: input, shape index: {}]   ;;  %s762_s3 = inlined_call_operand.vmem [shape: f32[16,32], index: 3, kind: input, shape index: {}]   ;;  %s763_s4 = inlined_call_operand.vmem [shape: f32[1,32], index: 4, kind: input, shape index: {}]   ;;  %s764_s5 = inlined_call_operand.hbm [shape: f32[16,32], index: 5, kind: output, shape index: {}]  }
   0x1   :  { %12 = vsyncpa [#allocation3 + $0x1], 0  ;;  %s640_s18 = smov 0   ;;  %s642_s19 = smov 0  }
   0x2   :  { %s644_s20 = smov 0   ;;  %s646_s21 = smov 0  }
   0x3 LB: > { %s661_s22 = sadd.s32 4294967295, %s605_s21   ;;  %s464_s23 = sadd.s32 4294967294, %s605_s21   ;;  %s605_s21 = sphi %s646_s21, %s770_s21   ;;  %s601_s20 = sphi %s644_s20, %s769_s20   ;;  %s597_s19 = sphi %s642_s19, %s768_s19   ;;  %s593_s18 = sphi %s640_s18, %s767_s18  }
   0x4   : > { %s665_s24 = sadd.s32 1, %s605_s21   ;;  %s135_s25 = sadd.s32 1, %s601_s20 }
   0x5   : > { %s132_s26 = ssub.s32 %s605_s21, %s665_s24  ;;  %p145_p0 = scmp.ne.s32.totalorder %s601_s20, %s597_s19 }
   0x6   : > { %p133_p1 = scmp.eq.s32.totalorder %s132_s26, 0  ;;  %p146_p2 = scmp.eq.s32.totalorder %s661_s22, 1 }
   0x7   : > { %p151_p3 = scmp.ne.s32.totalorder %s597_s19, %s593_s18  ;;  %p152_p4 = scmp.eq.s32.totalorder %s464_s23, 1 }
   0x8   : > { %s676_s27 = scalar_select %p133_p1, %s601_s20, %s135_s25  }
   0x9   : > { %p678_p5 = por %p146_p2, %p145_p0  ;;  %p682_p6 = por %p152_p4, %p151_p3 }
   0xa   : > { %p467_p7 = scmp.ge.s32.totalorder %s605_s21, 1  ;;  %p189_p8 = scmp.lt.s32.totalorder %s605_s21, 3 }
   0xc   : > { %p190_p9 = pnand %p467_p7, %p189_p8 }
   0xd   : > { %p216_p10 = scmp.lt.s32.totalorder (!%p190_p9), %s661_s22, 1  ;;  %s213_s8 = sand.u32 (!%p190_p9), 1, %s597_s19  }
   0xe   : > { %193 = sbr.rel (%p190_p9) target bundleno = 433 (0x1b1), region = 40  ;;  %s392_s23 = scalar_lea.sflag (!%p190_p9), [#allocation3], %s213_s8 }
  0x13   : > { %v224_v0 = vld [vmem:[%s760_s1 + $0x18] sm:$0xff]  ;;  %v607_v1 = vmov 0.0   ;;  %v223_v2 = vld [vmem:[%s760_s1 + $0x10] sm:$0xff]  ;;  %vm608_vm0 = vmmov 0   ;;  %s217_s9 = scalar_select %p216_p10, %s661_s22, 1  ;;  %v222_v3 = vld [vmem:[%s760_s1 + $0x8] sm:$0xff] }
  0x14   : > { %486 = vmatprep.subr.mxu0 %v607_v1  ;;  %494 = vmatprep.mubr.msk.f32.mxu0 %vm608_vm0, %v607_v1  ;;  %v221_v4 = vld [vmem:[%s760_s1] sm:$0xff]  ;;  %vm232_vm1 = vcmask 261120   ;;  %v308_v6 = vld [vmem:[%s762_s3 + $0x8] sm:$0xff]  ;;  %vm316_vm2 = vcmask 130048  }
  0x15   : > { %487 = vmatpush3.msra.mxu0 %v224_v0  ;;  %497 = vmatprep.subr.mxu1 %v607_v1  ;;  %s469_s12 = sshll.u32 %s217_s9, 3  ;;  %v307_v7 = vld [vmem:[%s762_s3] sm:$0xff]  ;;  %s468_s9 = sshll.u32 %s213_s8, 3 }
  0x16   : > { %488 = vmatprep.subr.mxu0 %v607_v1  ;;  %501 = vmatprep.mubr.msk.f32.mxu1 %vm608_vm0, %v607_v1  ;;  %s219_s17 = scalar_lea.vmem %s759_s0, %s469_s12  ;;  %v470_v8 = vld [vmem:[%s761_s2] ss:$0 sm:$0xff]  ;;  %s475_s12 = sshll.u32 %s661_s22, 7 }
  0x17   : > { %489 = vmatpush3.msra.mxu0 %v223_v2  ;;  %v220_v5 = vld [vmem:[%s219_s17] sm:$0xff]  ;;  %498 = vmatpush3.msra.mxu1 %v308_v6  ;;  %s215_s13 = scalar_lea.vmem [#allocation2], %s468_s9  ;;  %s723_s17 = scalar_lea.hbm %s764_s5, %s475_s12 }
  0x18   : > { %490 = vmatprep.subr.mxu0 %v607_v1  ;;  %499 = vmatprep.subr.mxu1 %v607_v1  ;;  %v472_v13 = vld [vmem:[%s763_s4] ss:$0 sm:$0xff]  ;;  %s405_s14 = sshll.u32 %s215_s13, 4  ;;  %s609_s22 = smov [#allocation2]   ;;  %s406_s14 = int_to_ptr.vmem [resolvable:$true] %s405_s14 }
  0x19   : > { %491 = vmatpush3.msra.mxu0 %v222_v3  ;;  %500 = vmatpush3.msra.mxu1 %v307_v7  ;;  %s545_s25 = scalar_lea.vmem %s406_s14, 128  ;;  %s549_s26 = sshll.u32 %s609_s22, 4  ;;  %s550_s26 = int_to_ptr.vmem [resolvable:$false] %s549_s26 }
  0x1a   : > { %492 = vmatprep.subr.mxu0 %v607_v1  ;;  %p546_p11 = scmp.ne.s32.totalorder %s406_s14, %s545_s25  ;;  %s551_s30 = scalar_lea.vmem %s550_s26, 256 }
  0x1b   : > { %493 = vmatpush3.msra.mxu0 %v221_v4  ;;  %p552_p0 = scmp.lt.s32.totalorder %s406_s14, %s550_s26  ;;  %p553_p1 = scmp.lt.s32.totalorder %s551_s30, %s545_s25 }
  0x1c   : > { %495 = vmatmul.mubr.msk.f32.vlgmr.msra.gmra.mxu0 %vm232_vm1, %v220_v5  ;;  %p547_p12 = pnand %p546_p11, %p678_p5 }
  0x1d   : > { %p554_p2 = por %p553_p1, %p552_p0 }
  0x1e   : > { %p548_p13 = pneg %p547_p12 }
  0x20   : > { %p555_p3 = pnand %p554_p2, %p548_p13 }
  0xdc   : > { %v302_v9 = vpop.f32.mrf.mxu0 }
  0xdd   : > { %v303_v10 = vadd.f32 %v470_v8, %v302_v9 }
  0xde   : > { %v496_v11 = vpop.f32.mrf.mxu0 }
  0xdf   : > { %v306_v12 = vmax.f32 %v303_v10, 0.0 }
  0xe1   : > { %502 = vmatmul.mubr.msk.f32.vlgmr.msra.gmra.mxu1 %vm316_vm2, %v306_v12 }
 0x1a1   : > { %v386_v14 = vpop.f32.mrf.mxu1 }
 0x1a2   : > { %v387_v15 = vadd.f32 %v472_v13, %v386_v14 }
 0x1a3   : > { %v503_v16 = vpop.f32.mrf.mxu1 }
 0x1a4   : > { %390 = vst.msk [vmem:[%s215_s13] sm:$0xff] %vm232_vm1, %v387_v15 }
 0x1a5   : > { %558 = shalt.err (!%p555_p3)
}
 0x1a6   : > { %s559_s6 = scalar_lea.hbm %s723_s17, 128  ;;  %s563_s9 = scalar_lea.hbm %s764_s5, 256 }
 0x1a7   : > { %p560_p4 = scmp.ne.s32.totalorder %s723_s17, %s559_s6  ;;  %p564_p9 = scmp.lt.s32.totalorder %s723_s17, %s764_s5 }
 0x1a8   : > { %p565_p10 = scmp.lt.s32.totalorder %s563_s9, %s559_s6 }
 0x1a9   : > { %p561_p7 = pnand %p560_p4, %p678_p5 }
 0x1aa   : > { %p566_p11 = por %p565_p10, %p564_p9 }
 0x1ab   : > { %p562_p8 = pneg %p561_p7 }
 0x1ad   : > { %p567_p12 = pnand %p566_p11, %p562_p8 }
 0x1af   : > { %570 = shalt.err (!%p567_p12)
}
 0x1b0   : > { %504 = dma.vmem_to_hbm [thread:$0]  (%p678_p5), %s406_s14, 128, %s723_s17, %s392_s23  }
 0x1b1 PF: > { %p510_p13 = scmp.ge.s32.totalorder %s605_s21, 2  ;;  %s417_s12 = sand.u32 1, %s593_s18  }
 0x1b2   : > { %s418_s13 = scalar_lea.sflag [#allocation3], %s417_s12 }
 0x1b3   : > { %p507_p0 = pnand %p510_p13, %p682_p6 }
 0x1b5   : > { %p508_p1 = pneg %p507_p0 }
 0x1b7   : > { %588 = dma.done.wait (%p508_p1), %s418_s13, 128  }
 0x1b8   : > { %590 = vsyncadd (%p508_p1), %s418_s13, 4294967168  ;;  %p15_p2 = scmp.ge.s32.totalorder %s665_s24, 4   ;;  %s767_s18 = smov %s597_s19 }
 0x1b9   : > { %s768_s19 = smov %s601_s20  ;;  %s769_s20 = smov %s676_s27 }
 0x1ba   : > { %s770_s21 = smov %s665_s24  ;;  %17 = sbr.rel (!%p15_p2) target bundleno = 3 (0x3), region = 75 }
 0x1bf   :  { %423 = vsyncpa [#allocation3], 1 }
 0x1c0   :  { %425 = vsyncpa [#allocation3 + $0x1], 1 }

</bundles_post_ra>
